<compile_context>
chip_gen: v5e
topology: v5e:2x2
jax: 0.10.0
libtpu: 0.0.40
codegen_flags: <defaults>
</compile_context>

<pallas_src>
import jax
import jax.numpy as jnp
from jax import lax
from jax.experimental import pallas as pl
from jax.experimental.pallas import tpu as pltpu


def _round_up(n, m):
    return -(-n // m) * m


def topo_decoder_kernel(x_ref, w1t_ref, b1t_ref, w2t_ref, b2t_ref,
                        w3t_ref, b3t_ref, ot_ref):
    # EDGE-BLOCK INVARIANT: the last row tile may extend past M; those rows
    # contain stale/garbage data and are only safe because every output
    # column below depends on its own input row alone (no reductions /
    # normalisation across the tm axis).  Keep it that way.
    #
    # First layer as a transposed-RHS contraction:
    #   (dim_out, dim_in) contract (tm, dim_in) on axis 1 of both -> (dim, tm)
    # This avoids an explicit x_ref[...].T (which would burn the same
    # vector-extended VLIW slots as the vmatmuls and materialise an extra
    # (dim, tm) VMEM temp per step).
    h = lax.dot_general(w1t_ref[...], x_ref[...],
                        dimension_numbers=(((1,), (1,)), ((), ())),
                        preferred_element_type=jnp.float32)
    h = jnp.maximum(h + b1t_ref[...], 0.0).astype(w2t_ref.dtype)
    h = jnp.dot(w2t_ref[...], h, preferred_element_type=jnp.float32)
    h = jnp.maximum(h + b2t_ref[...], 0.0).astype(w3t_ref.dtype)
    o = jnp.dot(w3t_ref[...], h, preferred_element_type=jnp.float32) + b3t_ref[...]
    ot_ref[...] = o.astype(ot_ref.dtype)        # (ms, tm): lane-dense even for ms == 1


def _vmem_bytes_estimate(tm, dim, ms, x_itemsize, w_itemsize):
    """Per-pipeline VMEM footprint, honouring (8, 128) layout padding."""
    lane_dim = _round_up(max(dim, 128), 128)
    sub_dim = _round_up(max(dim, 8), 8)
    lane_tm = _round_up(max(tm, 128), 128)
    sub_tm = _round_up(max(tm, 8), 8)
    sub_ms = _round_up(max(ms, 8), 8)
    x_tile = 2 * sub_tm * lane_dim * x_itemsize                 # double-buffered input
    out_tile = 2 * sub_ms * lane_tm * 4                         # double-buffered f32 output
    weights = 2 * w_itemsize * (2 * sub_dim * lane_dim          # W1^T, W2^T
                                + 2 * sub_dim * 128             # b1^T, b2^T (f32-sized ok)
                                + sub_ms * lane_dim             # W3^T
                                + sub_ms * 128)                 # b3^T
    acts = 3 * sub_dim * lane_tm * 4                            # in-kernel f32 temps
    return x_tile + out_tile + weights + acts


def _select_tile(M, dim, x_itemsize, vmem_cap, tm_max):
    """Pick the row-tile size tm and grid length."""
    # x-tile byte budget: big on 128-MiB parts (v5e/v6e), smaller under v7x.
    x_budget = (8 << 20) if vmem_cap >= (100 << 20) else (4 << 20)
    padded_row_bytes = _round_up(max(dim, 128), 128) * x_itemsize   # lane padding
    tm_cap = max(128, (x_budget // padded_row_bytes) // 128 * 128)
    tm = min(tm_max, tm_cap)
    if M <= tm:
        return M, 1                         # single full-extent block, no padding
    # Multi-tile: round the tile count up to an even number so both v7x
    # TensorCores ("parallel" grid axis) get balanced work.
    n_tiles = pl.cdiv(M, tm)
    if n_tiles % 2:
        n_tiles += 1
    tm = min(tm, _round_up(pl.cdiv(M, n_tiles), 128))
    return tm, pl.cdiv(M, tm)


def topo_decoder(occ_feat, params, *, tm=8192, compute_dtype=None,
                 vmem_limit_bytes=None):
    """occ_feat: (..., dim).  Returns (..., multi_step) float32."""
    w1, b1, w2, b2, w3, b3 = params          # stored as (in,out) / (1,out)
    dim = w1.shape[0]
    ms = w3.shape[1]

    lead_shape = occ_feat.shape[:-1]
    x = occ_feat.reshape(-1, dim)
    M = x.shape[0]

    if compute_dtype is not None:
        # Weights are tiny: casting them here is free.  For the HBM saving the
        # caller should pass occ_feat already in compute_dtype; a wrapper cast
        # of x would add a full extra HBM pass, so we only cast if mismatched.
        w1, w2, w3 = (w.astype(compute_dtype) for w in (w1, w2, w3))
        if x.dtype != compute_dtype:
            x = x.astype(compute_dtype)
    # Biases stay f32 (accumulation is f32 anyway).

    # Pre-transpose the (tiny) weights / biases for the transposed formulation.
    w1t, w2t, w3t = w1.T, w2.T, w3.T          # (out, in)
    b1t, b2t, b3t = b1.T, b2.T, b3.T          # (out, 1)

    # Generation-aware sizing (v5e/v6e: 128 MiB VMEM, v7x: 64 MiB per TC).
    try:
        vmem_cap = int(pltpu.get_tpu_info().vmem_capacity_bytes)
    except Exception:
        vmem_cap = 64 << 20                   # conservative fallback (v7x)

    x_itemsize = jnp.dtype(x.dtype).itemsize
    w_itemsize = jnp.dtype(w1t.dtype).itemsize
    tm, grid_m = _select_tile(M, dim, x_itemsize, vmem_cap, tm)

    if vmem_limit_bytes is None:
        need = _vmem_bytes_estimate(tm, dim, ms, x_itemsize, w_itemsize)
        # Requirement + margin, capped at 3/4 of physical so Mosaic keeps
        # headroom for internal scratch (matters on v7x's 64 MiB).
        vmem_limit_bytes = min(int(vmem_cap * 3 // 4),
                               max(need + (8 << 20), 16 << 20))

    out_t = pl.pallas_call(
        topo_decoder_kernel,
        out_shape=jax.ShapeDtypeStruct((ms, M), jnp.float32),
        grid_spec=pltpu.PrefetchScalarGridSpec(
            num_scalar_prefetch=0,
            grid=(grid_m,),
            in_specs=[
                pl.BlockSpec((tm, dim), lambda i: (i, 0)),     # x row tile
                pl.BlockSpec((dim, dim), lambda i: (0, 0)),    # W1^T
                pl.BlockSpec((dim, 1), lambda i: (0, 0)),      # b1^T
                pl.BlockSpec((dim, dim), lambda i: (0, 0)),    # W2^T
                pl.BlockSpec((dim, 1), lambda i: (0, 0)),      # b2^T
                pl.BlockSpec((ms, dim), lambda i: (0, 0)),     # W3^T
                pl.BlockSpec((ms, 1), lambda i: (0, 0)),       # b3^T
            ],
            out_specs=pl.BlockSpec((ms, tm), lambda i: (0, i)),
        ),
        compiler_params=pltpu.CompilerParams(
            dimension_semantics=("parallel",),   # shards row tiles across TCs
            vmem_limit_bytes=int(vmem_limit_bytes),
        ),
    )(x, w1t, b1t, w2t, b2t, w3t, b3t)

    # (ms, M) -> (..., ms); for ms == 1 this transpose is just a reshape.
    return out_t.T.reshape(*lead_shape, ms)


def init_params(key, dim, multi_step=1):
    """Deterministic synthetic init matching nn.Linear shapes (stored (in,out))."""
    k1, k2, k3, k4, k5, k6 = jax.random.split(key, 6)
    scale = 1.0 / jnp.sqrt(dim)
    w1 = jax.random.uniform(k1, (dim, dim), jnp.float32, -scale, scale)
    b1 = jax.random.uniform(k2, (1, dim), jnp.float32, -scale, scale)
    w2 = jax.random.uniform(k3, (dim, dim), jnp.float32, -scale, scale)
    b2 = jax.random.uniform(k4, (1, dim), jnp.float32, -scale, scale)
    w3 = jax.random.uniform(k5, (dim, multi_step), jnp.float32, -scale, scale)
    b3 = jax.random.uniform(k6, (1, multi_step), jnp.float32, -scale, scale)
    return (w1, b1, w2, b2, w3, b3)


def topo_decoder_ref(occ_feat, params):
    """Pure-JAX reference mirroring the PyTorch forward."""
    w1, b1, w2, b2, w3, b3 = params
    h = jnp.maximum(occ_feat @ w1 + b1[0], 0.0)
    h = jnp.maximum(h @ w2 + b2[0], 0.0)
    return h @ w3 + b3[0]


if __name__ == "__main__":
    key = jax.random.PRNGKey(0)
    k_in, k_p, k_in2 = jax.random.split(key, 3)

    batch, seq, dim, multi_step = 2, 8, 32, 1
    occ_feat = jax.random.normal(k_in, (batch, seq, dim), jnp.float32)
    params = init_params(k_p, dim, multi_step)

    # Small single-block path.
    out = jax.block_until_ready(topo_decoder(occ_feat, params))
    ref = topo_decoder_ref(occ_feat, params)
    assert out.shape == (batch, seq, multi_step), out.shape
    assert jnp.allclose(out, ref, atol=1e-4, rtol=1e-4), \
        float(jnp.max(jnp.abs(out - ref)))

    # Multi-tile + even-grid + partial edge-block path (force small tile cap).
    occ_big = jax.random.normal(k_in2, (5, 600, dim), jnp.float32)
    out_big = jax.block_until_ready(topo_decoder(occ_big, params, tm=1024))
    ref_big = topo_decoder_ref(occ_big, params)
    assert out_big.shape == (5, 600, multi_step), out_big.shape
    assert jnp.allclose(out_big, ref_big, atol=1e-4, rtol=1e-4), \
        float(jnp.max(jnp.abs(out_big - ref_big)))

    print("KERNEL_OK")
</pallas_src>

<mosaic_0001>
module attributes {stable_mosaic.version = 11 : i64} {
  func.func @topo_decoder_kernel(%arg0: i32, %arg1: memref<16x32xf32, #tpu.memory_space<vmem>>, %arg2: memref<32x32xf32, #tpu.memory_space<vmem>>, %arg3: memref<32x1xf32, #tpu.memory_space<vmem>>, %arg4: memref<32x32xf32, #tpu.memory_space<vmem>>, %arg5: memref<32x1xf32, #tpu.memory_space<vmem>>, %arg6: memref<1x32xf32, #tpu.memory_space<vmem>>, %arg7: memref<1x1xf32, #tpu.memory_space<vmem>>, %arg8: memref<1x16xf32, #tpu.memory_space<vmem>>) attributes {dimension_semantics = [#tpu.dimension_semantics<parallel>], iteration_bounds = array<i64: 1>, scalar_prefetch = 0 : i64, scratch_operands = 0 : i64, tpu.core_type = #tpu.core_type<tc>, window_params = [{transform_indices = @transform_0, window_bounds = array<i64: 16, 32>}, {pipeline_mode = #tpu.pipeline_mode<synchronous>, transform_indices = @transform_1, window_bounds = array<i64: 32, 32>}, {pipeline_mode = #tpu.pipeline_mode<synchronous>, transform_indices = @transform_2, window_bounds = array<i64: 32, 1>}, {pipeline_mode = #tpu.pipeline_mode<synchronous>, transform_indices = @transform_3, window_bounds = array<i64: 32, 32>}, {pipeline_mode = #tpu.pipeline_mode<synchronous>, transform_indices = @transform_4, window_bounds = array<i64: 32, 1>}, {pipeline_mode = #tpu.pipeline_mode<synchronous>, transform_indices = @transform_5, window_bounds = array<i64: 1, 32>}, {pipeline_mode = #tpu.pipeline_mode<synchronous>, transform_indices = @transform_6, window_bounds = array<i64: 1, 1>}, {transform_indices = @transform_7, window_bounds = array<i64: 1, 16>}]} {
    %c0 = arith.constant 0 : index
    %c0_0 = arith.constant 0 : index
    %0 = vector.load %arg2[%c0, %c0_0] : memref<32x32xf32, #tpu.memory_space<vmem>>, vector<32x32xf32>
    %c0_1 = arith.constant 0 : index
    %c0_2 = arith.constant 0 : index
    %1 = vector.load %arg1[%c0_1, %c0_2] : memref<16x32xf32, #tpu.memory_space<vmem>>, vector<16x32xf32>
    %cst = arith.constant dense<0.000000e+00> : vector<32x16xf32>
    %2 = tpu.matmul %0, %1, %cst {dimension_numbers = #tpu.dot_dimension_numbers<[1], [1], [0], [0], [0, 0, 1, 0], [], []>} : vector<32x32xf32>, vector<16x32xf32>, vector<32x16xf32> -> vector<32x16xf32>
    %c0_3 = arith.constant 0 : index
    %c0_4 = arith.constant 0 : index
    %3 = vector.load %arg3[%c0_3, %c0_4] : memref<32x1xf32, #tpu.memory_space<vmem>>, vector<32x1xf32>
    %4 = vector.broadcast %3 : vector<32x1xf32> to vector<32x16xf32>
    %5 = arith.addf %2, %4 : vector<32x16xf32>
    %cst_5 = arith.constant 0.000000e+00 : f32
    %6 = vector.broadcast %cst_5 : f32 to vector<32x16xf32>
    %7 = arith.maximumf %5, %6 : vector<32x16xf32>
    %c0_6 = arith.constant 0 : index
    %c0_7 = arith.constant 0 : index
    %8 = vector.load %arg4[%c0_6, %c0_7] : memref<32x32xf32, #tpu.memory_space<vmem>>, vector<32x32xf32>
    %cst_8 = arith.constant dense<0.000000e+00> : vector<32x16xf32>
    %9 = tpu.matmul %8, %7, %cst_8 {dimension_numbers = #tpu.dot_dimension_numbers<[1], [0], [0], [1], [0, 0, 1, 1], [], []>} : vector<32x32xf32>, vector<32x16xf32>, vector<32x16xf32> -> vector<32x16xf32>
    %c0_9 = arith.constant 0 : index
    %c0_10 = arith.constant 0 : index
    %10 = vector.load %arg5[%c0_9, %c0_10] : memref<32x1xf32, #tpu.memory_space<vmem>>, vector<32x1xf32>
    %11 = vector.broadcast %10 : vector<32x1xf32> to vector<32x16xf32>
    %12 = arith.addf %9, %11 : vector<32x16xf32>
    %cst_11 = arith.constant 0.000000e+00 : f32
    %13 = vector.broadcast %cst_11 : f32 to vector<32x16xf32>
    %14 = arith.maximumf %12, %13 : vector<32x16xf32>
    %c0_12 = arith.constant 0 : index
    %c0_13 = arith.constant 0 : index
    %15 = vector.load %arg6[%c0_12, %c0_13] : memref<1x32xf32, #tpu.memory_space<vmem>>, vector<1x32xf32>
    %cst_14 = arith.constant dense<0.000000e+00> : vector<1x16xf32>
    %16 = tpu.matmul %15, %14, %cst_14 {dimension_numbers = #tpu.dot_dimension_numbers<[1], [0], [0], [1], [0, 0, 1, 1], [], []>} : vector<1x32xf32>, vector<32x16xf32>, vector<1x16xf32> -> vector<1x16xf32>
    %c0_15 = arith.constant 0 : index
    %c0_16 = arith.constant 0 : index
    %17 = vector.load %arg7[%c0_15, %c0_16] : memref<1x1xf32, #tpu.memory_space<vmem>>, vector<1x1xf32>
    %18 = vector.broadcast %17 : vector<1x1xf32> to vector<1x16xf32>
    %19 = arith.addf %16, %18 : vector<1x16xf32>
    %c0_17 = arith.constant 0 : index
    %c0_18 = arith.constant 0 : index
    %20 = vector.load %arg8[%c0_17, %c0_18] : memref<1x16xf32, #tpu.memory_space<vmem>>, vector<1x16xf32>
    tpu.vector_store %arg8[%c0_17, %c0_18], %19 {strides = array<i32>} : memref<1x16xf32, #tpu.memory_space<vmem>>, vector<1x16xf32>,
    return
  }
  func.func @transform_0(%arg0: i32) -> (i32, i32) {
    %c0_i32 = arith.constant 0 : i32
    %c0_i32_0 = arith.constant 0 : i32
    return %arg0, %c0_i32 : i32, i32
  }
  func.func @transform_1(%arg0: i32) -> (i32, i32) {
    %c0_i32 = arith.constant 0 : i32
    %c0_i32_0 = arith.constant 0 : i32
    %c0_i32_1 = arith.constant 0 : i32
    return %c0_i32, %c0_i32_0 : i32, i32
  }
  func.func @transform_2(%arg0: i32) -> (i32, i32) {
    %c0_i32 = arith.constant 0 : i32
    %c0_i32_0 = arith.constant 0 : i32
    %c0_i32_1 = arith.constant 0 : i32
    return %c0_i32, %c0_i32_0 : i32, i32
  }
  func.func @transform_3(%arg0: i32) -> (i32, i32) {
    %c0_i32 = arith.constant 0 : i32
    %c0_i32_0 = arith.constant 0 : i32
    %c0_i32_1 = arith.constant 0 : i32
    return %c0_i32, %c0_i32_0 : i32, i32
  }
  func.func @transform_4(%arg0: i32) -> (i32, i32) {
    %c0_i32 = arith.constant 0 : i32
    %c0_i32_0 = arith.constant 0 : i32
    %c0_i32_1 = arith.constant 0 : i32
    return %c0_i32, %c0_i32_0 : i32, i32
  }
  func.func @transform_5(%arg0: i32) -> (i32, i32) {
    %c0_i32 = arith.constant 0 : i32
    %c0_i32_0 = arith.constant 0 : i32
    %c0_i32_1 = arith.constant 0 : i32
    return %c0_i32, %c0_i32_0 : i32, i32
  }
  func.func @transform_6(%arg0: i32) -> (i32, i32) {
    %c0_i32 = arith.constant 0 : i32
    %c0_i32_0 = arith.constant 0 : i32
    %c0_i32_1 = arith.constant 0 : i32
    return %c0_i32, %c0_i32_0 : i32, i32
  }
  func.func @transform_7(%arg0: i32) -> (i32, i32) {
    %c0_i32 = arith.constant 0 : i32
    %c0_i32_0 = arith.constant 0 : i32
    return %c0_i32, %arg0 : i32, i32
  }
}

</mosaic_0001>

<bundles_post_ra>
// kernel: tpu_custom_call.1
= control target key start
LH: loop header
LB: loop body
LE: loop exit
PB: predicated region body
PF: predicated region fallthrough
CT: control target
= control target key end

     0   :  { %s445_s0 = inlined_call_operand.hbm [shape: f32[16,32], index: 0, kind: input, shape index: {}]   ;;  %s446_s1 = inlined_call_operand.vmem [shape: f32[32,32], index: 1, kind: input, shape index: {}]   ;;  %s447_s2 = inlined_call_operand.vmem [shape: f32[32,1], index: 2, kind: input, shape index: {}]   ;;  %s448_s3 = inlined_call_operand.vmem [shape: f32[32,32], index: 3, kind: input, shape index: {}]   ;;  %s449_s4 = inlined_call_operand.vmem [shape: f32[32,1], index: 4, kind: input, shape index: {}]   ;;  %s450_s5 = inlined_call_operand.vmem [shape: f32[1,32], index: 5, kind: input, shape index: {}]   ;;  %s451_s6 = inlined_call_operand.<no memory space> [shape: f32[1,1], index: 6, kind: input, shape index: {}]   ;;  %s452_s7 = inlined_call_operand.hbm [shape: f32[1,16], index: 7, kind: output, shape index: {}]  }
   0x1   :  { %v12_v0 = vstv %s451_s6 }
   0x2   :  { %13 = vst [vmem:[#allocation2] sm:$0x1] %v12_v0 }
   0x3   :  { %14 = vsyncpa [#allocation4], 0 }
   0x4   :  { %15 = vsyncpa [#allocation5], 0  ;;  %s20_s28 = sshll.u32 %s445_s0, 4  ;;  %s327_s29 = smov [#allocation3]   ;;  %s21_s28 = int_to_ptr.hbm [resolvable:$true] %s20_s28 }
   0x5   :  { %s22_s30 = sshll.u32 %s327_s29, 4  ;;  %s328_s8 = smov 128   ;;  %s23_s30 = int_to_ptr.vmem [resolvable:$true] %s22_s30 }
   0x6   :  { %s329_s9 = smov 8  }
   0x7   :  { %28 = dma.hbm_to_vmem [thread:$0]  %s21_s28, 256, %s23_s30, [#allocation4], %s328_s8, %s328_s8, %s329_s9  }
   0x8   :  { %323 = dma.done.wait [#allocation4], 256  }
   0x9   :  { %324 = vsyncadd [#allocation4], 4294967040  ;;  %v330_v1 = vmov 0   ;;  %vm75_vm0 = vcmask 261120   ;;  %v50_v2 = vld [vmem:[#allocation3 + $0x8] sm:$0xff]  ;;  %v54_v3 = vld [vmem:[%s447_s2 + $0x18] sm:$0xff] }
   0xa   :  { %272 = vset.pattern.permute.xlu0 %v330_v1  ;;  %273 = vset.pattern.permute.xlu1 %v330_v1  ;;  %v52_v4 = vld [vmem:[%s447_s2 + $0x8] sm:$0xff]  ;;  %v45_v7 = vld [vmem:[%s446_s1] sm:$0xff]  ;;  %v53_v8 = vld [vmem:[%s447_s2 + $0x10] sm:$0xff]  ;;  %s331_s13 = smov [#allocation6]   ;;  %s240_s17 = sshll.u32 %s452_s7, 4  ;;  %vm231_vm1 = vcmask 122880   ;;  %s241_s17 = int_to_ptr.hbm [resolvable:$true] %s240_s17 }
   0xb   :  { %274 = vset.pattern.permute.xlu2 %v330_v1  ;;  %261 = vmatpush.xpose.msk.msra.mxu3 %vm75_vm0, %v50_v2  ;;  %v49_v5 = vld [vmem:[#allocation3] sm:$0xff]  ;;  %v47_v10 = vld [vmem:[%s446_s1 + $0x10] sm:$0xff]  ;;  %v48_v13 = vld [vmem:[%s446_s1 + $0x18] sm:$0xff]  ;;  %s238_s14 = sshll.u32 %s331_s13, 4  ;;  %s239_s14 = int_to_ptr.vmem [resolvable:$true] %s238_s14 }
   0xc   :  { %250 = vmatpush.xpose.msk.msra.mxu0 %vm75_vm0, %v50_v2  ;;  %72 = vperm.xlu0 %272, %v54_v3   ;;  %v46_v6 = vld [vmem:[%s446_s1 + $0x8] sm:$0xff]  ;;  %v51_v9 = vld [vmem:[%s447_s2] sm:$0xff]  ;;  %v134_v18 = vld [vmem:[%s449_s4 + $0x18] sm:$0xff] }
   0xd   :  { %62 = vperm.xlu1 %273, %v52_v4   ;;  %v132_v11 = vld [vmem:[%s449_s4 + $0x8] sm:$0xff]  ;;  %v131_v12 = vld [vmem:[%s449_s4] sm:$0xff]  ;;  %152 = vperm.xlu2 %274, %v134_v18   ;;  %v133_v26 = vld [vmem:[%s449_s4 + $0x10] sm:$0xff] }
   0xe   :  { %v127_v32 = vld [vmem:[%s448_s3] sm:$0xff]  ;;  %v128_v33 = vld [vmem:[%s448_s3 + $0x8] sm:$0xff]  ;;  %v129_v35 = vld [vmem:[%s448_s3 + $0x10] sm:$0xff] }
   0xf   :  { %262 = vmatpush.xpose.msk.msra.mxu3 %vm75_vm0, %v49_v5  ;;  %v201_v34 = vld [vmem:[#allocation2] sm:$0x1]  ;;  %v130_v36 = vld [vmem:[%s448_s3 + $0x18] sm:$0xff] }
  0x10   :  { %251 = vmatpush.xpose.msk.msra.mxu0 %vm75_vm0, %v49_v5  ;;  %v200_v53 = vld [vmem:[%s450_s5] sm:$0x1] }
  0x12   :  { %253 = vmatmul.msk.f32.vlgmr.msra.gmra.mxu3 %vm75_vm0, %v46_v6 }
  0x13   :  { %252 = vmatmul.msk.f32.vlgmr.msra.gmra.mxu0 %vm75_vm0, %v45_v7 }
  0x14   :  { %67 = vperm.xlu0 %272, %v53_v8  }
  0x15   :  { %57 = vperm.xlu1 %273, %v51_v9   ;;  %147 = vperm.xlu2 %274, %v133_v26  }
  0x1a   :  { %254 = vmatmul.msk.f32.gmra.mxu3 %vm75_vm0, %v47_v10 }
  0x1c   :  { %142 = vperm.xlu0 %272, %v132_v11  }
  0x1d   :  { %137 = vperm.xlu1 %273, %v131_v12   ;;  %204 = vperm.xlu2 %274, %v201_v34  }
  0x22   :  { %255 = vmatmul.msk.f32.gmra.mxu3 %vm75_vm0, %v48_v13 }
  0x67   :  { %v153_v38 = vpop.permute.xlu2 %152 }
  0x6f   :  { %v148_v40 = vpop.permute.xlu2 %147 }
  0x77   :  { %v205_v54 = vpop.permute.xlu2 %204 }
  0x78   :  { %v207_v55 = vperm.slane %v205_v54, 0 }
  0x7e   :  { %v73_v15 = vpop.permute.xlu0 %72 }
  0x7f   :  { %v63_v17 = vpop.permute.xlu1 %62 }
  0x86   :  { %v68_v19 = vpop.permute.xlu0 %67 }
  0x87   :  { %v58_v27 = vpop.permute.xlu1 %57 }
  0x8e   :  { %v143_v44 = vpop.permute.xlu0 %142 }
  0x8f   :  { %v138_v48 = vpop.permute.xlu1 %137 }
  0x90   :  { %v111_v23 = vpop.f32.mrf.mxu0 }
  0x91   :  { %v112_v29 = vadd.f32 %v111_v23, %v58_v27 }
  0x93   :  { %v123_v31 = vmax.f32 %v112_v29, 0.0 }
  0x95   :  { %v114_v14 = vpop.f32.mrf.mxu3 }
  0x96   :  { %v115_v24 = vadd.f32 %v114_v14, %v63_v17 }
  0x98   :  { %v124_v30 = vmax.f32 %v115_v24, 0.0 }
  0x9d   :  { %v117_v16 = vpop.f32.mrf.mxu3 }
  0x9e   :  { %v118_v21 = vadd.f32 %v117_v16, %v68_v19 }
  0xa0   :  { %v125_v28 = vmax.f32 %v118_v21, 0.0 }
  0xa5   :  { %v120_v20 = vpop.f32.mrf.mxu3 }
  0xa6   :  { %v121_v22 = vadd.f32 %v120_v20, %v73_v15 }
  0xa8   :  { %v126_v25 = vmax.f32 %v121_v22, 0.0 }
  0xaa   :  { %179 = vmatpush.msrb.mxu0 %v126_v25  ;;  %263 = vmatpush.msra.mxu1 %v126_v25 }
  0xac   :  { %180 = vmatpush.msrb.mxu0 %v125_v28  ;;  %264 = vmatpush.msra.mxu1 %v125_v28 }
  0xae   :  { %181 = vmatpush.msrb.mxu0 %v124_v30  ;;  %265 = vmatpush.msra.mxu1 %v124_v30 }
  0xb0   :  { %182 = vmatpush.msrb.mxu0 %v123_v31  ;;  %266 = vmatpush.msra.mxu1 %v123_v31 }
  0xb1   :  { %256 = vmatmul.msk.f32.vlgmr.msrb.gmra.mxu0 %vm75_vm0, %v127_v32  ;;  %257 = vmatmul.msk.f32.vlgmr.msra.gmra.mxu1 %vm75_vm0, %v128_v33 }
  0xb9   :  { %258 = vmatmul.msk.f32.gmra.mxu1 %vm75_vm0, %v129_v35 }
  0xc1   :  { %259 = vmatmul.msk.f32.gmra.mxu1 %vm75_vm0, %v130_v36 }
 0x12e   :  { %v187_v37 = vpop.f32.mrf.mxu1  ;;  %v184_v45 = vpop.f32.mrf.mxu0 }
 0x12f   :  { %v188_v46 = vadd.f32 %v187_v37, %v143_v44  ;;  %v185_v49 = vadd.f32 %v184_v45, %v138_v48 }
 0x131   :  { %v197_v51 = vmax.f32 %v188_v46, 0.0  ;;  %v196_v52 = vmax.f32 %v185_v49, 0.0 }
 0x136   :  { %v190_v39 = vpop.f32.mrf.mxu1 }
 0x137   :  { %v191_v42 = vadd.f32 %v190_v39, %v148_v40 }
 0x139   :  { %v198_v50 = vmax.f32 %v191_v42, 0.0 }
 0x13e   :  { %v193_v41 = vpop.f32.mrf.mxu1 }
 0x13f   :  { %v194_v43 = vadd.f32 %v193_v41, %v153_v38 }
 0x141   :  { %v199_v47 = vmax.f32 %v194_v43, 0.0 }
 0x143   :  { %223 = vmatpush.msra.mxu2 %v199_v47 }
 0x145   :  { %224 = vmatpush.msra.mxu2 %v198_v50 }
 0x147   :  { %225 = vmatpush.msra.mxu2 %v197_v51 }
 0x149   :  { %226 = vmatpush.msra.mxu2 %v196_v52 }
 0x14a   :  { %260 = vmatmul.msk.f32.vlgmr.msra.gmra.mxu2 %vm75_vm0, %v200_v53 }
 0x1cd   :  { %v228_v56 = vpop.f32.mrf.mxu2 }
 0x1ce   :  { %v229_v57 = vadd.f32 %v228_v56, %v207_v55 }
 0x1d0   :  { %232 = vst.msk [vmem:[#allocation6] sm:$0x1] %vm231_vm1, %v229_v57 }
 0x1d1   :  { %243 = dma.vmem_to_hbm [thread:$0]  %s239_s14, 16, %s241_s17, [#allocation5]  }
 0x1d2   :  { %325 = dma.done.wait [#allocation5], 16  }
 0x1d3   :  { %326 = vsyncadd [#allocation5], 4294967280 }
 0x1d4   :  { %248 = vsyncpa [#allocation4], 1 }
 0x1d5   :  { %249 = vsyncpa [#allocation5], 1 }

</bundles_post_ra>
